<compile_context>
chip_gen: v5e
topology: v5e:2x2
jax: 0.10.0
libtpu: 0.0.40
codegen_flags: <defaults>
</compile_context>

<pallas_src>
import jax
import jax.numpy as jnp
from jax import lax
from jax.experimental import pallas as pl
from jax.experimental.pallas import tpu as pltpu


def _round_up(n, m):
    return ((n + m - 1) // m) * m


def _leaky_relu(h, negative_slope=0.2):
    # Exact for slopes in (0, 1): mul + max instead of cmp + mul + select.
    return jnp.maximum(h, negative_slope * h)


def d_mlp_kernel(x_ref, w1_ref, b1_ref, w2_ref, b2_ref, w3_ref, b3_ref, o_ref):
    """Fused 3-layer MLP for one batch tile, feature-major (batch on lanes).

    x_ref : (tb, nx)  VMEM, f32   -- cast to bf16 in-kernel
    w1_ref: (nl, nx)  VMEM, bf16  -- torch layout (out, in)
    b1_ref: (nl, 1)   VMEM, f32
    w2_ref: (nl, nl)  VMEM, bf16
    b2_ref: (nl, 1)   VMEM, f32
    w3_ref: (1,  nl)  VMEM, bf16  -- final row vector
    b3_ref: (1,)      SMEM, f32 scalar
    o_ref : (1,  tb)  VMEM, f32   -- lane-dense: batch on the lane axis
    """
    # In-kernel cast of x (saves a separate wrapper-side HBM pass over x).
    x_bf = x_ref[...].astype(w1_ref.dtype)

    # Layer 1: hT = W1 @ x^T -> (nl, tb).  Contract x on its last (nx=16) dim;
    # nx is the tiny side, so any internal relayout of x is cheap XLU work.
    h = lax.dot_general(
        w1_ref[...], x_bf,
        dimension_numbers=(((1,), (1,)), ((), ())),
        preferred_element_type=jnp.float32)
    h = _leaky_relu(h + b1_ref[...])                    # bias broadcasts over lanes

    # Layer 2: MXU-native (nl, nl) @ (nl, tb).
    h = jnp.dot(w2_ref[...], h.astype(w2_ref.dtype),
                preferred_element_type=jnp.float32)
    h = _leaky_relu(h + b2_ref[...])

    # Layer 3: (1, nl) @ (nl, tb) -> (1, tb), already in the lane-dense layout.
    out_row = jnp.dot(w3_ref[...], h.astype(w3_ref.dtype),
                      preferred_element_type=jnp.float32)

    o_ref[...] = (out_row + b3_ref[0]).astype(o_ref.dtype)


def d_mlp_forward(x, params, *, batch_tile=4096, compute_dtype=jnp.bfloat16):
    """Fused D_mlp forward.  x: (B, nx) float32.  Returns jnp.squeeze over the
    trailing singleton (matching torch's out.squeeze())."""
    w1, b1, w2, b2, w3_row, b3 = params
    B, nx = x.shape
    nl = w1.shape[0]

    # Batch tile: multiple of 256 (unmasked lane-dense stores), as large as
    # `batch_tile`, but capped so the grid has >= 2 steps when the batch allows
    # it (lets v7x shard the "parallel" axis across both TensorCores).
    tb_max = _round_up(batch_tile, 256)
    tb_half = _round_up((B + 1) // 2, 256)
    tb = max(256, min(tb_max, tb_half))
    B_pad = _round_up(B, tb)
    num_tiles = B_pad // tb

    if B_pad != B:
        x = jnp.pad(x, ((0, B_pad - B), (0, 0)))

    # x stays f32 (cast happens in-kernel).  Weights -> compute dtype for the
    # MXU; biases stay f32 for the VPU epilogue.
    x_f = x.astype(jnp.float32)
    w1_c = w1.astype(compute_dtype)
    w2_c = w2.astype(compute_dtype)
    w3_c = w3_row.astype(compute_dtype)
    b1_f = b1.reshape(nl, 1).astype(jnp.float32)
    b2_f = b2.reshape(nl, 1).astype(jnp.float32)
    b3_s = b3.reshape((1,)).astype(jnp.float32)

    out = pl.pallas_call(
        d_mlp_kernel,
        out_shape=jax.ShapeDtypeStruct((num_tiles, 1, tb), jnp.float32),
        grid_spec=pltpu.PrefetchScalarGridSpec(
            num_scalar_prefetch=0,
            grid=(num_tiles,),
            in_specs=[
                pl.BlockSpec((tb, nx), lambda i: (i, 0)),    # x tile (f32)
                pl.BlockSpec((nl, nx), lambda i: (0, 0)),    # W1 (resident)
                pl.BlockSpec((nl, 1), lambda i: (0, 0)),     # b1
                pl.BlockSpec((nl, nl), lambda i: (0, 0)),    # W2 (resident)
                pl.BlockSpec((nl, 1), lambda i: (0, 0)),     # b2
                pl.BlockSpec((1, nl), lambda i: (0, 0)),     # w3 row (resident)
                pl.BlockSpec(memory_space=pltpu.MemorySpace.SMEM),  # b3 scalar
            ],
            # Lane-dense output: one (1, tb) row per grid step.
            out_specs=pl.BlockSpec((None, 1, tb), lambda i: (i, 0, 0)),
        ),
        compiler_params=pltpu.CompilerParams(
            dimension_semantics=("parallel",)),
    )(x_f, w1_c, b1_f, w2_c, b2_f, w3_c, b3_s)

    out = out.reshape(B_pad)[:B]     # undo lane-dense packing + batch padding
    return jnp.squeeze(out)          # matches torch .squeeze()


def init_params(key, nx, nl):
    """Deterministic init matching PyTorch nn.Linear defaults (uniform
    +-1/sqrt(fan_in)).  Weights are kept in the torch (out, in) layout, which
    is exactly what the feature-major kernel consumes."""
    k1, k2, k3, k4, k5, k6 = jax.random.split(key, 6)

    def linear_init(kw, kb, fan_in, fan_out):
        bound = 1.0 / jnp.sqrt(fan_in)
        w = jax.random.uniform(kw, (fan_out, fan_in), jnp.float32, -bound, bound)
        b = jax.random.uniform(kb, (fan_out,), jnp.float32, -bound, bound)
        return w, b

    w1, b1 = linear_init(k1, k2, nx, nl)   # (nl, nx), (nl,)
    w2, b2 = linear_init(k3, k4, nl, nl)   # (nl, nl), (nl,)
    w3, b3 = linear_init(k5, k6, nl, 1)    # (1, nl),  (1,)

    return (w1, b1.reshape(nl, 1),
            w2, b2.reshape(nl, 1),
            w3, b3)


def d_mlp_reference(x, params, compute_dtype=jnp.float32):
    """Pure-JAX reference mirroring the kernel's precision choices
    (matmul operands in compute_dtype, f32 accumulation, f32 elementwise)."""
    w1, b1, w2, b2, w3_row, b3 = params
    cd = compute_dtype
    h = jnp.dot(x.astype(cd), w1.astype(cd).T,
                preferred_element_type=jnp.float32) + b1.reshape(1, -1)
    h = jnp.maximum(h, 0.2 * h)
    h = jnp.dot(h.astype(cd), w2.astype(cd).T,
                preferred_element_type=jnp.float32) + b2.reshape(1, -1)
    h = jnp.maximum(h, 0.2 * h)
    out = jnp.dot(h.astype(cd), w3_row.astype(cd).T,
                  preferred_element_type=jnp.float32) + b3   # (B, 1)
    return jnp.squeeze(out)


if __name__ == "__main__":
    key = jax.random.PRNGKey(0)
    kx, kx2, kp = jax.random.split(key, 3)

    nx, nl = 16, 32   # D_mlp(nx=16, nl=32)
    B = 8             # small demo batch

    x = jax.random.normal(kx, (B, nx), dtype=jnp.float32)
    params = init_params(kp, nx, nl)

    out = jax.block_until_ready(d_mlp_forward(x, params))
    ref = d_mlp_reference(x, params, compute_dtype=jnp.bfloat16)
    assert out.shape == ref.shape == (B,), (out.shape, ref.shape)
    assert jnp.allclose(out, ref, atol=2e-3, rtol=2e-3), (
        "mismatch", float(jnp.max(jnp.abs(out - ref))))

    # Multi-tile / padded batch path (exercises lane-dense tiled output and the
    # num_tiles >= 2 megacore-friendly grid).
    B2 = 1000
    x2 = jax.random.normal(kx2, (B2, nx), dtype=jnp.float32)
    out2 = jax.block_until_ready(d_mlp_forward(x2, params))
    ref2 = d_mlp_reference(x2, params, compute_dtype=jnp.bfloat16)
    assert out2.shape == ref2.shape == (B2,), (out2.shape, ref2.shape)
    assert jnp.allclose(out2, ref2, atol=2e-3, rtol=2e-3), (
        "mismatch", float(jnp.max(jnp.abs(out2 - ref2))))

    print("KERNEL_OK")
</pallas_src>

<mosaic_0001>
module attributes {stable_mosaic.version = 11 : i64} {
  func.func @d_mlp_kernel(%arg0: i32, %arg1: memref<256x16xf32, #tpu.memory_space<vmem>>, %arg2: memref<32x16xbf16, #tpu.memory_space<vmem>>, %arg3: memref<32x1xf32, #tpu.memory_space<vmem>>, %arg4: memref<32x32xbf16, #tpu.memory_space<vmem>>, %arg5: memref<32x1xf32, #tpu.memory_space<vmem>>, %arg6: memref<1x32xbf16, #tpu.memory_space<vmem>>, %arg7: memref<1xf32, #tpu.memory_space<smem>>, %arg8: memref<1x1x256xf32, #tpu.memory_space<vmem>>) attributes {dimension_semantics = [#tpu.dimension_semantics<parallel>], iteration_bounds = array<i64: 1>, scalar_prefetch = 0 : i64, scratch_operands = 0 : i64, tpu.core_type = #tpu.core_type<tc>, window_params = [{transform_indices = @transform_0, window_bounds = array<i64: 256, 16>}, {pipeline_mode = #tpu.pipeline_mode<synchronous>, transform_indices = @transform_1, window_bounds = array<i64: 32, 16>}, {pipeline_mode = #tpu.pipeline_mode<synchronous>, transform_indices = @transform_2, window_bounds = array<i64: 32, 1>}, {pipeline_mode = #tpu.pipeline_mode<synchronous>, transform_indices = @transform_3, window_bounds = array<i64: 32, 32>}, {pipeline_mode = #tpu.pipeline_mode<synchronous>, transform_indices = @transform_4, window_bounds = array<i64: 32, 1>}, {pipeline_mode = #tpu.pipeline_mode<synchronous>, transform_indices = @transform_5, window_bounds = array<i64: 1, 32>}, {transform_indices = @transform_6, window_bounds = array<i64: 1>}, {transform_indices = @transform_7, window_bounds = array<i64: 1, 1, 256>}]} {
    %c0 = arith.constant 0 : index
    %c0_0 = arith.constant 0 : index
    %0 = vector.load %arg1[%c0, %c0_0] : memref<256x16xf32, #tpu.memory_space<vmem>>, vector<256x16xf32>
    %1 = arith.truncf %0 : vector<256x16xf32> to vector<256x16xbf16>
    %c0_1 = arith.constant 0 : index
    %c0_2 = arith.constant 0 : index
    %2 = vector.load %arg2[%c0_1, %c0_2] : memref<32x16xbf16, #tpu.memory_space<vmem>>, vector<32x16xbf16>
    %cst = arith.constant dense<0.000000e+00> : vector<32x256xf32>
    %3 = tpu.matmul %2, %1, %cst {dimension_numbers = #tpu.dot_dimension_numbers<[1], [1], [0], [0], [0, 0, 1, 0], [], []>} : vector<32x16xbf16>, vector<256x16xbf16>, vector<32x256xf32> -> vector<32x256xf32>
    %c0_3 = arith.constant 0 : index
    %c0_4 = arith.constant 0 : index
    %4 = vector.load %arg3[%c0_3, %c0_4] : memref<32x1xf32, #tpu.memory_space<vmem>>, vector<32x1xf32>
    %5 = vector.broadcast %4 : vector<32x1xf32> to vector<32x256xf32>
    %6 = arith.addf %3, %5 : vector<32x256xf32>
    %cst_5 = arith.constant 2.000000e-01 : f32
    %7 = vector.broadcast %cst_5 : f32 to vector<32x256xf32>
    %8 = arith.mulf %7, %6 : vector<32x256xf32>
    %9 = arith.maximumf %6, %8 : vector<32x256xf32>
    %c0_6 = arith.constant 0 : index
    %c0_7 = arith.constant 0 : index
    %10 = vector.load %arg4[%c0_6, %c0_7] : memref<32x32xbf16, #tpu.memory_space<vmem>>, vector<32x32xbf16>
    %11 = arith.truncf %9 : vector<32x256xf32> to vector<32x256xbf16>
    %cst_8 = arith.constant dense<0.000000e+00> : vector<32x256xf32>
    %12 = tpu.matmul %10, %11, %cst_8 {dimension_numbers = #tpu.dot_dimension_numbers<[1], [0], [0], [1], [0, 0, 1, 1], [], []>} : vector<32x32xbf16>, vector<32x256xbf16>, vector<32x256xf32> -> vector<32x256xf32>
    %c0_9 = arith.constant 0 : index
    %c0_10 = arith.constant 0 : index
    %13 = vector.load %arg5[%c0_9, %c0_10] : memref<32x1xf32, #tpu.memory_space<vmem>>, vector<32x1xf32>
    %14 = vector.broadcast %13 : vector<32x1xf32> to vector<32x256xf32>
    %15 = arith.addf %12, %14 : vector<32x256xf32>
    %cst_11 = arith.constant 2.000000e-01 : f32
    %16 = vector.broadcast %cst_11 : f32 to vector<32x256xf32>
    %17 = arith.mulf %16, %15 : vector<32x256xf32>
    %18 = arith.maximumf %15, %17 : vector<32x256xf32>
    %c0_12 = arith.constant 0 : index
    %c0_13 = arith.constant 0 : index
    %19 = vector.load %arg6[%c0_12, %c0_13] : memref<1x32xbf16, #tpu.memory_space<vmem>>, vector<1x32xbf16>
    %20 = arith.truncf %18 : vector<32x256xf32> to vector<32x256xbf16>
    %cst_14 = arith.constant dense<0.000000e+00> : vector<1x256xf32>
    %21 = tpu.matmul %19, %20, %cst_14 {dimension_numbers = #tpu.dot_dimension_numbers<[1], [0], [0], [1], [0, 0, 1, 1], [], []>} : vector<1x32xbf16>, vector<32x256xbf16>, vector<1x256xf32> -> vector<1x256xf32>
    %c0_15 = arith.constant 0 : index
    %22 = memref.load %arg7[%c0_15] : memref<1xf32, #tpu.memory_space<smem>>
    %23 = vector.broadcast %22 : f32 to vector<1x256xf32>
    %24 = arith.addf %21, %23 : vector<1x256xf32>
    %c0_16 = arith.constant 0 : index
    %c0_17 = arith.constant 0 : index
    %c0_18 = arith.constant 0 : index
    %25 = vector.load %arg8[%c0_16, %c0_17, %c0_18] : memref<1x1x256xf32, #tpu.memory_space<vmem>>, vector<1x1x256xf32>
    %26 = vector.shape_cast %25 : vector<1x1x256xf32> to vector<1x256xf32>
    %27 = vector.shape_cast %24 : vector<1x256xf32> to vector<1x1x256xf32>
    tpu.vector_store %arg8[%c0_16, %c0_17, %c0_18], %27 {strides = array<i32>} : memref<1x1x256xf32, #tpu.memory_space<vmem>>, vector<1x1x256xf32>,
    return
  }
  func.func @transform_0(%arg0: i32) -> (i32, i32) {
    %c0_i32 = arith.constant 0 : i32
    %c0_i32_0 = arith.constant 0 : i32
    return %arg0, %c0_i32 : i32, i32
  }
  func.func @transform_1(%arg0: i32) -> (i32, i32) {
    %c0_i32 = arith.constant 0 : i32
    %c0_i32_0 = arith.constant 0 : i32
    %c0_i32_1 = arith.constant 0 : i32
    return %c0_i32, %c0_i32_0 : i32, i32
  }
  func.func @transform_2(%arg0: i32) -> (i32, i32) {
    %c0_i32 = arith.constant 0 : i32
    %c0_i32_0 = arith.constant 0 : i32
    %c0_i32_1 = arith.constant 0 : i32
    return %c0_i32, %c0_i32_0 : i32, i32
  }
  func.func @transform_3(%arg0: i32) -> (i32, i32) {
    %c0_i32 = arith.constant 0 : i32
    %c0_i32_0 = arith.constant 0 : i32
    %c0_i32_1 = arith.constant 0 : i32
    return %c0_i32, %c0_i32_0 : i32, i32
  }
  func.func @transform_4(%arg0: i32) -> (i32, i32) {
    %c0_i32 = arith.constant 0 : i32
    %c0_i32_0 = arith.constant 0 : i32
    %c0_i32_1 = arith.constant 0 : i32
    return %c0_i32, %c0_i32_0 : i32, i32
  }
  func.func @transform_5(%arg0: i32) -> (i32, i32) {
    %c0_i32 = arith.constant 0 : i32
    %c0_i32_0 = arith.constant 0 : i32
    %c0_i32_1 = arith.constant 0 : i32
    return %c0_i32, %c0_i32_0 : i32, i32
  }
  func.func @transform_6(%arg0: i32) -> i32 {
    %c0_i32 = arith.constant 0 : i32
    %c0_i32_0 = arith.constant 0 : i32
    return %c0_i32 : i32
  }
  func.func @transform_7(%arg0: i32) -> (i32, i32, i32) {
    %c0_i32 = arith.constant 0 : i32
    %c0_i32_0 = arith.constant 0 : i32
    %c0_i32_1 = arith.constant 0 : i32
    return %arg0, %c0_i32, %c0_i32_0 : i32, i32, i32
  }
}

</mosaic_0001>

<bundles_post_ra>
// kernel: tpu_custom_call.1
= control target key start
LH: loop header
LB: loop body
LE: loop exit
PB: predicated region body
PF: predicated region fallthrough
CT: control target
= control target key end

     0   :  { %vm115_vm0 = vcmask 130048   ;;  %s660_s0 = inlined_call_operand.vmem [shape: f32[256,16], index: 0, kind: input, shape index: {}]   ;;  %s661_s1 = inlined_call_operand.vmem [shape: bf16[32,16], index: 1, kind: input, shape index: {}]   ;;  %s662_s2 = inlined_call_operand.vmem [shape: f32[32,1], index: 2, kind: input, shape index: {}]   ;;  %s663_s3 = inlined_call_operand.vmem [shape: bf16[32,32], index: 3, kind: input, shape index: {}]   ;;  %s664_s4 = inlined_call_operand.vmem [shape: f32[32,1], index: 4, kind: input, shape index: {}]   ;;  %s665_s5 = inlined_call_operand.vmem [shape: bf16[1,32], index: 5, kind: input, shape index: {}]   ;;  %s666_s6 = inlined_call_operand.<no memory space> [shape: f32[1], index: 6, kind: input, shape index: {}]   ;;  %s667_s7 = inlined_call_operand.hbm [shape: f32[1,1,256], index: 7, kind: output, shape index: {}]  }
   0x1   :  { %v43_v0 = vld [vmem:[%s660_s0 + $0x70] sm:$0xff]  ;;  %v44_v1 = vld [vmem:[%s660_s0 + $0x78] sm:$0xff]  ;;  %v41_v6 = vld [vmem:[%s660_s0 + $0x60] sm:$0xff] }
   0x2   :  { %v59_v2 = vld [vmem:[%s660_s0 + $0xf0] sm:$0xff]  ;;  %v68_v3 = vpack.c.bf16 %v44_v1, %v43_v0  ;;  %v60_v4 = vld [vmem:[%s660_s0 + $0xf8] sm:$0xff]  ;;  %v42_v7 = vld [vmem:[%s660_s0 + $0x68] sm:$0xff] }
   0x3   :  { %v76_v5 = vpack.c.bf16 %v60_v4, %v59_v2  ;;  %v57_v9 = vld [vmem:[%s660_s0 + $0xe0] sm:$0xff]  ;;  %v58_v10 = vld [vmem:[%s660_s0 + $0xe8] sm:$0xff]  ;;  %v67_v12 = vpack.c.bf16 %v42_v7, %v41_v6 }
   0x4   :  { %v144_v8 = vsel %vm115_vm0, %v68_v3, 0  ;;  %v75_v13 = vpack.c.bf16 %v58_v10, %v57_v9 }
   0x5   :  { %170 = vmatpush.bf16.xpose.msra.mxu0 %v144_v8  ;;  %v168_v11 = vsel %vm115_vm0, %v76_v5, 0 }
   0x6   :  { %189 = vmatpush.bf16.xpose.msra.mxu1 %v168_v11 }
   0x7   :  { %13 = vsyncpa [#allocation4], 0  ;;  %v141_v14 = vsel %vm115_vm0, %v67_v12, 0  ;;  %v165_v15 = vsel %vm115_vm0, %v75_v13, 0  ;;  %v39_v16 = vld [vmem:[%s660_s0 + $0x50] sm:$0xff]  ;;  %v40_v17 = vld [vmem:[%s660_s0 + $0x58] sm:$0xff] }
   0x8   :  { %v55_v18 = vld [vmem:[%s660_s0 + $0xd0] sm:$0xff]  ;;  %v56_v19 = vld [vmem:[%s660_s0 + $0xd8] sm:$0xff]  ;;  %v66_v20 = vpack.c.bf16 %v40_v17, %v39_v16  ;;  %v37_v24 = vld [vmem:[%s660_s0 + $0x40] sm:$0xff]  ;;  %v451_v47 = vmov 0   ;;  %vm266_vm1 = vcmask 261120   ;;  %s452_s19 = smov [#allocation3]  }
   0x9   :  { %v74_v21 = vpack.c.bf16 %v56_v19, %v55_v18  ;;  %v38_v25 = vld [vmem:[%s660_s0 + $0x48] sm:$0xff]  ;;  %v53_v26 = vld [vmem:[%s660_s0 + $0xc0] sm:$0xff]  ;;  %v35_v32 = vld [vmem:[%s660_s0 + $0x30] sm:$0xff]  ;;  %423 = vset.pattern.permute.xlu1 %v451_v47  ;;  %422 = vset.pattern.permute.xlu0 %v451_v47  ;;  %s379_s20 = sshll.u32 %s452_s19, 4  ;;  %s381_s23 = sshll.u32 %s667_s7, 4  ;;  %vm366_vm2 = vcmask 1040384   ;;  %s380_s20 = int_to_ptr.vmem [resolvable:$true] %s379_s20  ;;  %s382_s23 = int_to_ptr.hbm [resolvable:$true] %s381_s23 }
   0xa   :  { %v138_v22 = vsel %vm115_vm0, %v66_v20, 0  ;;  %v54_v27 = vld [vmem:[%s660_s0 + $0xc8] sm:$0xff]  ;;  %v65_v28 = vpack.c.bf16 %v38_v25, %v37_v24  ;;  %v36_v33 = vld [vmem:[%s660_s0 + $0x38] sm:$0xff]  ;;  %v51_v34 = vld [vmem:[%s660_s0 + $0xb0] sm:$0xff]  ;;  %424 = vset.pattern.permute.xlu2 %v451_v47 }
   0xb   :  { %v162_v23 = vsel %vm115_vm0, %v74_v21, 0  ;;  %v73_v29 = vpack.c.bf16 %v54_v27, %v53_v26  ;;  %v52_v35 = vld [vmem:[%s660_s0 + $0xb8] sm:$0xff]  ;;  %v64_v36 = vpack.c.bf16 %v36_v33, %v35_v32  ;;  %v33_v40 = vld [vmem:[%s660_s0 + $0x20] sm:$0xff]  ;;  %v34_v41 = vld [vmem:[%s660_s0 + $0x28] sm:$0xff] }
   0xc   :  { %v135_v30 = vsel %vm115_vm0, %v65_v28, 0  ;;  %v72_v37 = vpack.c.bf16 %v52_v35, %v51_v34  ;;  %v49_v42 = vld [vmem:[%s660_s0 + $0xa0] sm:$0xff]  ;;  %v50_v43 = vld [vmem:[%s660_s0 + $0xa8] sm:$0xff]  ;;  %v83_v44 = vld [vmem:[%s662_s2 + $0x10] sm:$0xff]  ;;  %v63_v46 = vpack.c.bf16 %v34_v41, %v33_v40 }
   0xd   :  { %171 = vmatpush.bf16.xpose.msra.mxu0 %v141_v14  ;;  %v159_v31 = vsel %vm115_vm0, %v73_v29, 0  ;;  %v132_v38 = vsel %vm115_vm0, %v64_v36, 0  ;;  %v81_v45 = vld [vmem:[%s662_s2] sm:$0xff]  ;;  %v71_v48 = vpack.c.bf16 %v50_v43, %v49_v42  ;;  %97 = vperm.xlu0 %422, %v83_v44   ;;  %v31_v51 = vld [vmem:[%s660_s0 + $0x10] sm:$0xff]  ;;  %v32_v52 = vld [vmem:[%s660_s0 + $0x18] sm:$0xff] }
   0xe   :  { %190 = vmatpush.bf16.xpose.msra.mxu1 %v165_v15  ;;  %v156_v39 = vsel %vm115_vm0, %v72_v37, 0  ;;  %87 = vperm.xlu1 %423, %v81_v45   ;;  %v129_v49 = vsel %vm115_vm0, %v63_v46, 0  ;;  %v47_v53 = vld [vmem:[%s660_s0 + $0x90] sm:$0xff]  ;;  %v48_v54 = vld [vmem:[%s660_s0 + $0x98] sm:$0xff]  ;;  %v62_v55 = vpack.c.bf16 %v32_v52, %v31_v51  ;;  %v29_v59 = vld [vmem:[%s660_s0] sm:$0xff] }
   0xf   :  { %v153_v50 = vsel %vm115_vm0, %v71_v48, 0  ;;  %v70_v56 = vpack.c.bf16 %v48_v54, %v47_v53  ;;  %v30_v60 = vld [vmem:[%s660_s0 + $0x8] sm:$0xff]  ;;  %v45_v61 = vld [vmem:[%s660_s0 + $0x80] sm:$0xff]  ;;  %v84_v63 = vld [vmem:[%s662_s2 + $0x18] sm:$0xff] }
  0x10   :  { %v126_v57 = vsel %vm115_vm0, %v62_v55, 0  ;;  %v46_v62 = vld [vmem:[%s660_s0 + $0x88] sm:$0xff]  ;;  %v61_v1 = vpack.c.bf16 %v30_v60, %v29_v59  ;;  %v232_v5 = vld [vmem:[%s664_s4] sm:$0xff]  ;;  %v234_v28 = vld [vmem:[%s664_s4 + $0x10] sm:$0xff] }
  0x11   :  { %v150_v58 = vsel %vm115_vm0, %v70_v56, 0  ;;  %v82_v0 = vld [vmem:[%s662_s2 + $0x8] sm:$0xff]  ;;  %v69_v2 = vpack.c.bf16 %v46_v62, %v45_v61  ;;  %v416_v7 = vld [vmem:[%s661_s1] sm:$0xff]  ;;  %248 = vperm.xlu2 %424, %v234_v28   ;;  %v235_v44 = vld [vmem:[%s664_s4 + $0x18] sm:$0xff] }
  0x12   :  { %v123_v3 = vsel %vm115_vm0, %v61_v1, 0  ;;  %v233_v6 = vld [vmem:[%s664_s4 + $0x8] sm:$0xff]  ;;  %v418_v51 = vld [vmem:[%s663_s3] sm:$0xff] }
  0x13   :  { %v147_v4 = vsel %vm115_vm0, %v69_v2, 0  ;;  %v417_v8 = vld [vmem:[%s661_s1 + $0x8] sm:$0xff] }
  0x14   :  { %v419_v52 = vld [vmem:[%s663_s3 + $0x8] sm:$0xff] }
  0x15   :  { %172 = vmatpush.bf16.xpose.msra.mxu0 %v138_v22  ;;  %102 = vperm.xlu0 %422, %v84_v63  }
  0x16   :  { %191 = vmatpush.bf16.xpose.msra.mxu1 %v162_v23  ;;  %92 = vperm.xlu1 %423, %v82_v0  }
  0x19   :  { %253 = vperm.xlu2 %424, %v235_v44  }
  0x1d   :  { %173 = vmatpush.bf16.xpose.msra.mxu0 %v135_v30  ;;  %238 = vperm.xlu0 %422, %v232_v5  }
  0x1e   :  { %192 = vmatpush.bf16.xpose.msra.mxu1 %v159_v31  ;;  %243 = vperm.xlu1 %423, %v233_v6  }
  0x25   :  { %174 = vmatpush.bf16.xpose.msra.mxu0 %v132_v38 }
  0x26   :  { %193 = vmatpush.bf16.xpose.msra.mxu1 %v156_v39 }
  0x2d   :  { %175 = vmatpush.bf16.xpose.msra.mxu0 %v129_v49 }
  0x2e   :  { %194 = vmatpush.bf16.xpose.msra.mxu1 %v153_v50 }
  0x35   :  { %176 = vmatpush.bf16.xpose.msra.mxu0 %v126_v57 }
  0x36   :  { %195 = vmatpush.bf16.xpose.msra.mxu1 %v150_v58 }
  0x3d   :  { %177 = vmatpush.bf16.xpose.msra.mxu0 %v123_v3 }
  0x3e   :  { %196 = vmatpush.bf16.xpose.msra.mxu1 %v147_v4 }
  0x44   :  { %398 = vmatmul.msk.bf16.vlgmr.msra.gmra.mxu0 %vm115_vm0, %v416_v7 }
  0x45   :  { %400 = vmatmul.msk.bf16.vlgmr.msra.gmra.mxu1 %vm115_vm0, %v416_v7 }
  0x54   :  { %399 = vmatmul.msk.bf16.gmra.mxu0 %vm115_vm0, %v417_v8 }
  0x55   :  { %401 = vmatmul.msk.bf16.gmra.mxu1 %vm115_vm0, %v417_v8 }
  0x6b   :  { %v249_v57 = vpop.permute.xlu2 %248 }
  0x73   :  { %v254_v2 = vpop.permute.xlu2 %253 }
  0x7f   :  { %v98_v14 = vpop.permute.xlu0 %97 }
  0x80   :  { %v88_v13 = vpop.permute.xlu1 %87 }
  0x87   :  { %v103_v21 = vpop.permute.xlu0 %102 }
  0x88   :  { %v93_v17 = vpop.permute.xlu1 %92 }
  0x8f   :  { %v239_v63 = vpop.permute.xlu0 %238 }
  0x90   :  { %v244_v61 = vpop.permute.xlu1 %243 }
  0xc1   :  { %v179_v9 = vpop.f32.mrf.mxu0 }
  0xc2   :  { %v198_v10 = vpop.f32.mrf.mxu1  ;;  %v180_v24 = vadd.f32 %v179_v9, %v88_v13 }
  0xc3   :  { %v199_v29 = vadd.f32 %v198_v10, %v88_v13 }
  0xc4   :  { %v208_v36 = vmul.f32 0.2, %v180_v24 }
  0xc5   :  { %v209_v39 = vmul.f32 0.2, %v199_v29 }
  0xc6   :  { %v216_v47 = vmax.f32 %v180_v24, %v208_v36 }
  0xc7   :  { %v217_v48 = vmax.f32 %v199_v29, %v209_v39  ;;  %v327_v29 = vld [vmem:[%s665_s5] sm:$0x1] }
  0xc9   :  { %v181_v11 = vpop.f32.mrf.mxu0 }
  0xca   :  { %v200_v12 = vpop.f32.mrf.mxu1  ;;  %v182_v20 = vadd.f32 %v181_v11, %v93_v17 }
  0xcb   :  { %v201_v22 = vadd.f32 %v200_v12, %v93_v17 }
  0xcc   :  { %v210_v32 = vmul.f32 0.2, %v182_v20 }
  0xcd   :  { %v211_v34 = vmul.f32 0.2, %v201_v22 }
  0xce   :  { %v218_v42 = vmax.f32 %v182_v20, %v210_v32  ;;  %v369_v32 = vlaneseq }
  0xcf   :  { %v219_v45 = vmax.f32 %v201_v22, %v211_v34 }
  0xd0   :  { %v228_v49 = vpack.c.bf16 %v218_v42, %v216_v47  ;;  %vm371_vm3 = vcmp.lt.s32.totalorder %v369_v32, 256 }
  0xd1   :  { %v184_v15 = vpop.f32.mrf.mxu0  ;;  %v229_v50 = vpack.c.bf16 %v219_v45, %v217_v48 }
  0xd2   :  { %v203_v16 = vpop.f32.mrf.mxu1  ;;  %v185_v18 = vadd.f32 %v184_v15, %v98_v14 }
  0xd3   :  { %v204_v19 = vadd.f32 %v203_v16, %v98_v14 }
  0xd4   :  { %v212_v25 = vmul.f32 0.2, %v185_v18 }
  0xd5   :  { %v213_v30 = vmul.f32 0.2, %v204_v19 }
  0xd6   :  { %v220_v37 = vmax.f32 %v185_v18, %v212_v25 }
  0xd7   :  { %v221_v40 = vmax.f32 %v204_v19, %v213_v30  ;;  %v333_v30 = vstv %s666_s6 }
  0xd9   :  { %v186_v23 = vpop.f32.mrf.mxu0 }
  0xda   :  { %v187_v26 = vadd.f32 %v186_v23, %v103_v21  ;;  %v205_v27 = vpop.f32.mrf.mxu1 }
  0xdb   :  { %v206_v31 = vadd.f32 %v205_v27, %v103_v21 }
  0xdc   :  { %v214_v33 = vmul.f32 0.2, %v187_v26 }
  0xdd   :  { %v215_v35 = vmul.f32 0.2, %v206_v31 }
  0xde   :  { %v222_v38 = vmax.f32 %v187_v26, %v214_v33 }
  0xdf   :  { %v223_v41 = vmax.f32 %v206_v31, %v215_v35 }
  0xe0   :  { %v230_v43 = vpack.c.bf16 %v222_v38, %v220_v37 }
  0xe1   :  { %v231_v46 = vpack.c.bf16 %v223_v41, %v221_v40 }
  0xe2   :  { %279 = vmatpush.bf16.msra.mxu2 %v230_v43 }
  0xe3   :  { %298 = vmatpush.bf16.msra.mxu3 %v231_v46 }
  0xe6   :  { %280 = vmatpush.bf16.msra.mxu2 %v228_v49 }
  0xe7   :  { %299 = vmatpush.bf16.msra.mxu3 %v229_v50 }
  0xe9   :  { %410 = vmatmul.msk.bf16.vlgmr.msra.gmra.mxu2 %vm266_vm1, %v418_v51 }
  0xea   :  { %412 = vmatmul.msk.bf16.vlgmr.msra.gmra.mxu3 %vm266_vm1, %v418_v51 }
  0xf9   :  { %411 = vmatmul.msk.bf16.gmra.mxu2 %vm266_vm1, %v419_v52 }
  0xfa   :  { %413 = vmatmul.msk.bf16.gmra.mxu3 %vm266_vm1, %v419_v52 }
 0x16c   :  { %v282_v53 = vpop.f32.mrf.mxu2 }
 0x16d   :  { %v301_v54 = vpop.f32.mrf.mxu3  ;;  %v283_v4 = vadd.f32 %v282_v53, %v239_v63 }
 0x16e   :  { %v302_v8 = vadd.f32 %v301_v54, %v239_v63 }
 0x16f   :  { %v311_v15 = vmul.f32 0.2, %v283_v4 }
 0x170   :  { %v312_v18 = vmul.f32 0.2, %v302_v8 }
 0x171   :  { %v319_v25 = vmax.f32 %v283_v4, %v311_v15 }
 0x172   :  { %v320_v26 = vmax.f32 %v302_v8, %v312_v18 }
 0x174   :  { %v284_v55 = vpop.f32.mrf.mxu2 }
 0x175   :  { %v303_v56 = vpop.f32.mrf.mxu3  ;;  %v285_v0 = vadd.f32 %v284_v55, %v244_v61 }
 0x176   :  { %v304_v1 = vadd.f32 %v303_v56, %v244_v61 }
 0x177   :  { %v313_v11 = vmul.f32 0.2, %v285_v0 }
 0x178   :  { %v314_v13 = vmul.f32 0.2, %v304_v1 }
 0x179   :  { %v321_v21 = vmax.f32 %v285_v0, %v313_v11 }
 0x17a   :  { %v322_v23 = vmax.f32 %v304_v1, %v314_v13 }
 0x17b   :  { %v328_v27 = vpack.c.bf16 %v321_v21, %v319_v25 }
 0x17c   :  { %v287_v58 = vpop.f32.mrf.mxu2  ;;  %v329_v28 = vpack.c.bf16 %v322_v23, %v320_v26 }
 0x17d   :  { %v306_v59 = vpop.f32.mrf.mxu3  ;;  %v288_v60 = vadd.f32 %v287_v58, %v249_v57 }
 0x17e   :  { %v307_v62 = vadd.f32 %v306_v59, %v249_v57 }
 0x17f   :  { %v315_v5 = vmul.f32 0.2, %v288_v60 }
 0x180   :  { %v316_v9 = vmul.f32 0.2, %v307_v62 }
 0x181   :  { %v323_v16 = vmax.f32 %v288_v60, %v315_v5 }
 0x182   :  { %v324_v19 = vmax.f32 %v307_v62, %v316_v9 }
 0x184   :  { %v289_v3 = vpop.f32.mrf.mxu2 }
 0x185   :  { %v290_v6 = vadd.f32 %v289_v3, %v254_v2  ;;  %v308_v7 = vpop.f32.mrf.mxu3 }
 0x186   :  { %v309_v10 = vadd.f32 %v308_v7, %v254_v2 }
 0x187   :  { %v317_v12 = vmul.f32 0.2, %v290_v6 }
 0x188   :  { %v318_v14 = vmul.f32 0.2, %v309_v10 }
 0x189   :  { %v325_v17 = vmax.f32 %v290_v6, %v317_v12 }
 0x18a   :  { %v326_v20 = vmax.f32 %v309_v10, %v318_v14 }
 0x18b   :  { %v330_v22 = vpack.c.bf16 %v325_v17, %v323_v16 }
 0x18c   :  { %v331_v24 = vpack.c.bf16 %v326_v20, %v324_v19 }
 0x18d   :  { %343 = vmatpush.bf16.msrb.mxu2 %v330_v22 }
 0x18e   :  { %356 = vmatpush.bf16.msrb.mxu3 %v331_v24 }
 0x191   :  { %344 = vmatpush.bf16.msrb.mxu2 %v328_v27 }
 0x192   :  { %357 = vmatpush.bf16.msrb.mxu3 %v329_v28 }
 0x194   :  { %414 = vmatmul.msk.bf16.vlgmr.msrb.gmra.mxu2 %vm266_vm1, %v327_v29 }
 0x195   :  { %415 = vmatmul.msk.bf16.vlgmr.msrb.gmra.mxu3 %vm266_vm1, %v327_v29 }
 0x217   :  { %v346_v31 = vpop.f32.mrf.mxu2 }
 0x218   :  { %v359_v33 = vpop.f32.mrf.mxu3  ;;  %v347_v35 = vadd.f32 %v346_v31, %v333_v30 }
 0x219   :  { %v360_v34 = vadd.f32 %v359_v33, %v333_v30 }
 0x21b   :  { %v365_v36 = vrot.slane %v360_v34, 7 }
 0x21d   :  { %v367_v37 = vsel %vm366_vm2, %v347_v35, %v365_v36 }
 0x21e   :  { %373 = vst.msk [vmem:[#allocation3] sm:$0x3] %vm371_vm3, %v367_v37 }
 0x21f   :  { %v348_v38 = vpop.f32.mrf.mxu2  ;;  %384 = dma.vmem_to_hbm [thread:$0]  %s380_s20, 32, %s382_s23, [#allocation4]  }
 0x220   :  { %v361_v39 = vpop.f32.mrf.mxu3 }
 0x221   :  { %449 = dma.done.wait [#allocation4], 32  }
 0x222   :  { %450 = vsyncadd [#allocation4], 4294967264 }
 0x223   :  { %389 = vsyncpa [#allocation4], 1 }

</bundles_post_ra>
